<compile_context>
chip_gen: v5e
topology: v5e:2x2
jax: 0.10.0
libtpu: 0.0.40
codegen_flags: <defaults>
</compile_context>

<pallas_src>
import functools

import jax
import jax.numpy as jnp
from jax.experimental import pallas as pl
from jax.experimental.pallas import tpu as pltpu


def _round_up(x, m):
    return (x + m - 1) // m * m


def _nll_loss_kernel(pred_ref, tgt_ref, out_ref, acc_ref, *, inv_n):
    """One grid step: accumulate the target-class log-probs of one sample tile.

    pred_ref: (C, tile) log-probs, native dtype (classes on sublanes, samples on lanes)
    tgt_ref:  (1, tile) int32 class ids (-1 marks padded samples)
    out_ref:  (1, 1) f32 partial loss for this split (written at the last inner step)
    acc_ref:  (C, tile) f32 unreduced accumulator (persists across the inner axis)
    """
    t = pl.program_id(1)

    @pl.when(t == 0)
    def _init():
        acc_ref[...] = jnp.zeros_like(acc_ref)

    # Upcast right after load; HBM still streams the native dtype.
    pred = pred_ref[...].astype(jnp.float32)                       # (C, tile)
    cls_id = jax.lax.broadcasted_iota(jnp.int32, pred.shape, 0)    # class id per sublane
    hit = cls_id == tgt_ref[...]                                   # (C,tile) vs (1,tile) broadcast
    # No per-step reduction: just compare + select + add into the resident accumulator.
    acc_ref[...] += jnp.where(hit, pred, jnp.float32(0.0))

    @pl.when(t == pl.num_programs(1) - 1)
    def _finalize():
        # Single cross-lane reduce + negate + 1/N scale, once per split.
        out_ref[...] = jnp.float32(-inv_n) * jnp.sum(acc_ref[...], keepdims=True)


def _choose_tile(n, c, itemsize, budget_bytes=2 * 1024 * 1024):
    # ~2 MiB pred tiles (mem-bound roofline sweet spot); lanes carry samples,
    # so the tile width must be a multiple of 128.
    per_sample = max(c, 1) * max(itemsize, 1)
    cap = max(128, (budget_bytes // per_sample) // 128 * 128)
    return max(128, min(cap, _round_up(n, 128)))


def get_loss(pred, target, trans_feat=None, *, tile_samples=None, num_splits=None):
    """NLL loss with mean reduction, matching F.nll_loss(pred, target).

    pred: (N, C) log-probabilities (any float dtype; upcast to f32 in-kernel)
    target: (N,) integer class indices
    trans_feat: ignored (kept for API parity with the PyTorch module)
    """
    n, c = pred.shape
    itemsize = jnp.dtype(pred.dtype).itemsize

    if tile_samples is None:
        tile = _choose_tile(n, c, itemsize)
    else:
        tile = max(128, _round_up(int(tile_samples), 128))
    num_tiles = pl.cdiv(n, tile)

    if num_splits is None:
        # TODO(synk): gate on pltpu.get_tpu_info() core count (2 TCs on v7x) instead of N alone.
        num_splits = 2 if n >= (1 << 18) else 1
    num_splits = max(1, int(num_splits))
    t_inner = pl.cdiv(num_tiles, num_splits)
    n_pad = num_splits * t_inner * tile

    # Lane-dense layout plumbing (no dtype cast): classes -> sublanes, samples -> lanes.
    pred_cn = pred.T                                                         # (C, N)
    tgt_row = jnp.pad(target.astype(jnp.int32), (0, n_pad - n),
                      constant_values=-1).reshape(1, n_pad)                  # (1, N_pad)

    pred_spec_kwargs = {}
    if num_tiles > 2:
        # Deepen pipelining only when there is actually a stream to hide latency on.
        pred_spec_kwargs = dict(pipeline_mode=pl.Buffered(3))
    pred_spec = pl.BlockSpec((c, tile), lambda s, t: (0, s * t_inner + t),
                             **pred_spec_kwargs)
    tgt_spec = pl.BlockSpec((1, tile), lambda s, t: (0, s * t_inner + t))

    kernel = functools.partial(_nll_loss_kernel, inv_n=1.0 / float(n))

    partials = pl.pallas_call(
        kernel,
        out_shape=jax.ShapeDtypeStruct((num_splits, 1), jnp.float32),
        grid_spec=pltpu.PrefetchScalarGridSpec(
            num_scalar_prefetch=0,
            grid=(num_splits, t_inner),
            in_specs=[pred_spec, tgt_spec],
            out_specs=pl.BlockSpec((1, 1), lambda s, t: (s, 0)),
            scratch_shapes=[pltpu.VMEM((c, tile), jnp.float32)],
        ),
        compiler_params=pltpu.CompilerParams(
            dimension_semantics=("parallel", "arbitrary"),  # split axis / streaming axis
            vmem_limit_bytes=32 * 1024 * 1024,
        ),
        cost_estimate=pl.CostEstimate(
            flops=3 * n * c,
            transcendentals=0,
            bytes_accessed=n * c * itemsize + n_pad * 4 + num_splits * 4,
        ),
    )(pred_cn, tgt_row)

    # Sum of per-split partials (each already scaled by -1/N).
    return jnp.sum(partials)


if __name__ == "__main__":
    key = jax.random.PRNGKey(0)
    k1, k2, k3, k4, k5, k6, k7, k8, k9 = jax.random.split(key, 9)

    def ref_loss(p, t):
        p32 = p.astype(jnp.float32)
        return -jnp.mean(p32[jnp.arange(p.shape[0]), t])

    # --- small shape consistent with the module (batch=8, 40 ModelNet classes) ---
    N, C = 8, 40
    pred = jax.nn.log_softmax(jax.random.normal(k1, (N, C), jnp.float32), axis=-1)
    target = jax.random.randint(k2, (N,), 0, C, dtype=jnp.int32)
    trans_feat = jax.random.normal(k3, (N, 64, 64), jnp.float32)   # unused by the loss
    loss = jax.block_until_ready(get_loss(pred, target, trans_feat))
    assert jnp.allclose(loss, ref_loss(pred, target), atol=1e-6), (loss, ref_loss(pred, target))

    # --- multi-tile streaming path (ragged last tile, Buffered(3) active) ---
    N2, C2 = 1000, 40
    pred2 = jax.nn.log_softmax(jax.random.normal(k4, (N2, C2), jnp.float32), axis=-1)
    target2 = jax.random.randint(k5, (N2,), 0, C2, dtype=jnp.int32)
    loss2 = jax.block_until_ready(get_loss(pred2, target2, tile_samples=256))
    assert jnp.allclose(loss2, ref_loss(pred2, target2), atol=1e-5), (loss2, ref_loss(pred2, target2))

    # --- 2-way split path (v7x megacore; correct on 1-TC chips too) ---
    N3, C3 = 1000, 16
    pred3 = jax.nn.log_softmax(jax.random.normal(k6, (N3, C3), jnp.float32), axis=-1)
    target3 = jax.random.randint(k7, (N3,), 0, C3, dtype=jnp.int32)
    loss3 = jax.block_until_ready(get_loss(pred3, target3, tile_samples=128, num_splits=2))
    assert jnp.allclose(loss3, ref_loss(pred3, target3), atol=1e-5), (loss3, ref_loss(pred3, target3))

    # --- native bf16 pred path (no wrapper cast; upcast happens in-kernel) ---
    N4, C4 = 300, 40
    pred4 = jax.nn.log_softmax(jax.random.normal(k8, (N4, C4), jnp.float32),
                               axis=-1).astype(jnp.bfloat16)
    target4 = jax.random.randint(k9, (N4,), 0, C4, dtype=jnp.int32)
    loss4 = jax.block_until_ready(get_loss(pred4, target4))
    assert jnp.allclose(loss4, ref_loss(pred4, target4), atol=1e-5), (loss4, ref_loss(pred4, target4))

    print("KERNEL_OK")
</pallas_src>

<mosaic_0001>
module attributes {stable_mosaic.version = 11 : i64} {
  func.func @_nll_loss_kernel(%arg0: i32, %arg1: i32, %arg2: memref<40x128xf32, #tpu.memory_space<vmem>>, %arg3: memref<1x128xi32, #tpu.memory_space<vmem>>, %arg4: memref<1x1xf32, #tpu.memory_space<vmem>>, %arg5: memref<40x128xf32, #tpu.memory_space<vmem>>) attributes {dimension_semantics = [#tpu.dimension_semantics<parallel>, #tpu.dimension_semantics<arbitrary>], iteration_bounds = array<i64: 1, 1>, scalar_prefetch = 0 : i64, scratch_operands = 1 : i64, tpu.core_type = #tpu.core_type<tc>, window_params = [{transform_indices = @transform_0, window_bounds = array<i64: 40, 128>}, {transform_indices = @transform_1, window_bounds = array<i64: 1, 128>}, {transform_indices = @transform_2, window_bounds = array<i64: 1, 1>}]} {
    %c0_i32 = arith.constant 0 : i32
    %0 = arith.cmpi eq, %arg1, %c0_i32 : i32
    %1 = arith.extui %0 : i1 to i32
    %c0_i32_0 = arith.constant 0 : i32
    %2 = arith.cmpi ne, %1, %c0_i32_0 : i32
    scf.if %2 {
      %cst_10 = arith.constant 0.000000e+00 : f32
      %16 = vector.broadcast %cst_10 : f32 to vector<40x128xf32>
      %c0_11 = arith.constant 0 : index
      %c0_12 = arith.constant 0 : index
      %17 = vector.load %arg5[%c0_11, %c0_12] : memref<40x128xf32, #tpu.memory_space<vmem>>, vector<40x128xf32>
      tpu.vector_store %arg5[%c0_11, %c0_12], %16 {strides = array<i32>} : memref<40x128xf32, #tpu.memory_space<vmem>>, vector<40x128xf32>,
    } else {
    }
    %c0 = arith.constant 0 : index
    %c0_1 = arith.constant 0 : index
    %3 = vector.load %arg2[%c0, %c0_1] : memref<40x128xf32, #tpu.memory_space<vmem>>, vector<40x128xf32>
    %4 = tpu.iota {dimensions = array<i32: 0>} : vector<40x128xi32>
    %c0_2 = arith.constant 0 : index
    %c0_3 = arith.constant 0 : index
    %5 = vector.load %arg3[%c0_2, %c0_3] : memref<1x128xi32, #tpu.memory_space<vmem>>, vector<1x128xi32>
    %6 = vector.broadcast %5 : vector<1x128xi32> to vector<40x128xi32>
    %7 = arith.cmpi eq, %4, %6 : vector<40x128xi32>
    %c0_4 = arith.constant 0 : index
    %c0_5 = arith.constant 0 : index
    %8 = vector.load %arg5[%c0_4, %c0_5] : memref<40x128xf32, #tpu.memory_space<vmem>>, vector<40x128xf32>
    %cst = arith.constant 0.000000e+00 : f32
    %9 = vector.broadcast %cst : f32 to vector<40x128xf32>
    %10 = arith.select %7, %3, %9 : vector<40x128xi1>, vector<40x128xf32>
    %11 = arith.addf %8, %10 : vector<40x128xf32>
    %c0_6 = arith.constant 0 : index
    %c0_7 = arith.constant 0 : index
    %12 = vector.load %arg5[%c0_6, %c0_7] : memref<40x128xf32, #tpu.memory_space<vmem>>, vector<40x128xf32>
    tpu.vector_store %arg5[%c0_6, %c0_7], %11 {strides = array<i32>} : memref<40x128xf32, #tpu.memory_space<vmem>>, vector<40x128xf32>,
    %c0_i32_8 = arith.constant 0 : i32
    %13 = arith.cmpi eq, %arg1, %c0_i32_8 : i32
    %14 = arith.extui %13 : i1 to i32
    %c0_i32_9 = arith.constant 0 : i32
    %15 = arith.cmpi ne, %14, %c0_i32_9 : i32
    scf.if %15 {
      %c0_10 = arith.constant 0 : index
      %c0_11 = arith.constant 0 : index
      %16 = vector.load %arg5[%c0_10, %c0_11] : memref<40x128xf32, #tpu.memory_space<vmem>>, vector<40x128xf32>
      %17 = vector.shape_cast %16 : vector<40x128xf32> to vector<1x40x128xf32>
      %cst_12 = arith.constant dense<0.000000e+00> : vector<1xf32>
      %18 = vector.multi_reduction <add>, %17, %cst_12 [1, 2] : vector<1x40x128xf32> to vector<1xf32>
      %19 = vector.shape_cast %18 : vector<1xf32> to vector<1x1x1xf32>
      %20 = vector.extract %19[0, 0, 0] : f32 from vector<1x1x1xf32>
      %21 = vector.broadcast %20 : f32 to vector<1x1xf32>
      %cst_13 = arith.constant -1.250000e-01 : f32
      %22 = vector.broadcast %cst_13 : f32 to vector<1x1xf32>
      %23 = arith.mulf %22, %21 : vector<1x1xf32>
      %c0_14 = arith.constant 0 : index
      %c0_15 = arith.constant 0 : index
      %24 = vector.load %arg4[%c0_14, %c0_15] : memref<1x1xf32, #tpu.memory_space<vmem>>, vector<1x1xf32>
      tpu.vector_store %arg4[%c0_14, %c0_15], %23 {strides = array<i32>} : memref<1x1xf32, #tpu.memory_space<vmem>>, vector<1x1xf32>,
    } else {
    }
    return
  }
  func.func @transform_0(%arg0: i32, %arg1: i32) -> (i32, i32) {
    %c1_i32 = arith.constant 1 : i32
    %0 = arith.muli %arg0, %c1_i32 : i32
    %1 = arith.addi %0, %arg1 : i32
    %c0_i32 = arith.constant 0 : i32
    %c0_i32_0 = arith.constant 0 : i32
    return %c0_i32, %1 : i32, i32
  }
  func.func @transform_1(%arg0: i32, %arg1: i32) -> (i32, i32) {
    %c1_i32 = arith.constant 1 : i32
    %0 = arith.muli %arg0, %c1_i32 : i32
    %1 = arith.addi %0, %arg1 : i32
    %c0_i32 = arith.constant 0 : i32
    %c0_i32_0 = arith.constant 0 : i32
    return %c0_i32, %1 : i32, i32
  }
  func.func @transform_2(%arg0: i32, %arg1: i32) -> (i32, i32) {
    %c0_i32 = arith.constant 0 : i32
    %c0_i32_0 = arith.constant 0 : i32
    return %arg0, %c0_i32 : i32, i32
  }
}

</mosaic_0001>

<bundles_post_ra>
// kernel: tpu_custom_call.1
= control target key start
LH: loop header
LB: loop body
LE: loop exit
PB: predicated region body
PF: predicated region fallthrough
CT: control target
= control target key end

     0   :  { %v57_v0 = vlaneseq  ;;  %s207_s0 = inlined_call_operand.vmem [shape: f32[40,8], index: 0, kind: input, shape index: {}]   ;;  %s208_s1 = inlined_call_operand.vmem [shape: s32[1,128], index: 1, kind: input, shape index: {}]   ;;  %s209_s2 = inlined_call_operand.hbm [shape: f32[1,1], index: 2, kind: output, shape index: {}]  }
   0x1   :  { %v143_v2 = vld [vmem:[%s208_s1] ss:$0 sm:$0xff] }
   0x2   :  { %v58_v1 = vshrl.u32 %v57_v0, 7 }
   0x3   :  { %7 = vsyncpa [#allocation4], 0  ;;  %v52_v3 = vld [vmem:[%s207_s0] sm:$0xff]  ;;  %v53_v4 = vld [vmem:[%s207_s0 + $0x8] sm:$0xff]  ;;  %s170_s20 = smov [#allocation3]   ;;  %s122_s23 = sshll.u32 %s209_s2, 4  ;;  %s123_s23 = int_to_ptr.hbm [resolvable:$true] %s122_s23 }
   0x4   :  { %v54_v5 = vld [vmem:[%s207_s0 + $0x10] sm:$0xff]  ;;  %v59_v6 = vadd.s32 8, %v58_v1  ;;  %v60_v7 = vadd.s32 16, %v58_v1  ;;  %v61_v8 = vadd.s32 24, %v58_v1  ;;  %v62_v9 = vadd.s32 32, %v58_v1  ;;  %v55_v10 = vld [vmem:[%s207_s0 + $0x18] sm:$0xff] }
   0x5   :  { %vm65_vm0 = vcmp.eq.s32.totalorder %v58_v1, %v143_v2  ;;  %v56_v14 = vld [vmem:[%s207_s0 + $0x20] sm:$0xff]  ;;  %s120_s21 = sshll.u32 %s170_s20, 4  ;;  %vm113_vm5 = vcmask 0   ;;  %s121_s21 = int_to_ptr.vmem [resolvable:$true] %s120_s21 }
   0x6   :  { %vm66_vm1 = vcmp.eq.s32.totalorder %v59_v6, %v143_v2  ;;  %vm67_vm2 = vcmp.eq.s32.totalorder %v60_v7, %v143_v2  ;;  %vm68_vm3 = vcmp.eq.s32.totalorder %v61_v8, %v143_v2  ;;  %v75_v11 = vsel %vm65_vm0, %v52_v3, 0.0 }
   0x7   :  { %v76_v12 = vsel %vm66_vm1, %v53_v4, 0.0  ;;  %v77_v13 = vsel %vm67_vm2, %v54_v5, 0.0  ;;  %vm69_vm4 = vcmp.eq.s32.totalorder %v62_v9, %v143_v2  ;;  %v78_v16 = vsel %vm68_vm3, %v55_v10, 0.0 }
   0x8   :  { %v98_v15 = vadd.f32 %v76_v12, %v75_v11  ;;  %v79_v18 = vsel %vm69_vm4, %v56_v14, 0.0 }
   0xa   :  { %v99_v17 = vadd.f32 %v98_v15, %v77_v13 }
   0xc   :  { %v100_v19 = vadd.f32 %v99_v17, %v78_v16 }
   0xe   :  { %v101_v20 = vadd.f32 %v100_v19, %v79_v18 }
  0x10   :  { %102 = vadd.xlane.f32.xlu0 %v101_v20 }
  0x83   :  { %v103_v21 = vpop.xlane.xlu0 %102 }
  0x84   :  { %v104_v22 = vrot.slane %v103_v21, 4 }
  0x86   :  { %v105_v23 = vadd.f32 %v104_v22, %v103_v21 }
  0x88   :  { %v106_v24 = vrot.slane %v105_v23, 2 }
  0x8a   :  { %v107_v25 = vadd.f32 %v106_v24, %v105_v23 }
  0x8c   :  { %v108_v26 = vrot.slane %v107_v25, 1 }
  0x8e   :  { %v109_v27 = vadd.f32 %v108_v26, %v107_v25 }
  0x90   :  { %140 = vpush %v109_v27 }
  0xc1   :  { %s141_s24 = spop %140 }
  0xc2   :  { %v111_v28 = vstv %s141_s24 }
  0xc3   :  { %v112_v29 = vmul.f32 -0.125, %v111_v28 }
  0xc5   :  { %114 = vst.msk [vmem:[#allocation3] sm:$0x1] %vm113_vm5, %v112_v29 }
  0xc6   :  { %125 = dma.vmem_to_hbm [thread:$0]  %s121_s21, 16, %s123_s23, [#allocation4]  }
  0xc7   :  { %168 = dma.done.wait [#allocation4], 16  }
  0xc8   :  { %169 = vsyncadd [#allocation4], 4294967280 }
  0xc9   :  { %130 = vsyncpa [#allocation4], 1 }

</bundles_post_ra>
